<compile_context>
chip_gen: v6e
topology: v6e:2x2x1
jax: 0.10.0
libtpu: 0.0.40
codegen_flags: <defaults>
</compile_context>

<pallas_src>
import string

import numpy as np
import jax
import jax.numpy as jnp
from jax import lax
from jax.experimental import pallas as pl
from jax.experimental.pallas import tpu as pltpu


LANE = 128                 # TPU lane width; classifier dim is padded to this.
NEG_INF = -1e30            # masks padded classifier lanes out of the log-sum-exp.
SEQ_BUCKETS = (8, 16, 32, 64)


def rnn_seq_kernel(len_ref, h0_ref, x_ref, whh_ref, wlin_ref, blin_ref,
                   logp_ref, hn_ref):
    """Whole sequence in one invocation; h carried as fori_loop carry (vregs).

    len_ref  : SMEM int32[1]   true sequence length (scalar-prefetched)
    h0_ref   : (1, H)  f32     initial hidden state
    x_ref    : (T_pad, H) f32  pre-gathered W_ih^T rows + (b_ih + b_hh)
    whh_ref  : (H, H)  bf16    W_hh^T
    wlin_ref : (H, OP) bf16    W_lin^T zero-padded to OP=128 lanes
    blin_ref : (1, OP) f32     b_lin, padded lanes = -1e30
    logp_ref : (1, OP) f32     log-softmax of the LAST step (lane-dense)
    hn_ref   : (1, H)  f32     final hidden state
    """
    seq_len = len_ref[0]
    whh = whh_ref[...]                       # loop-invariant bf16 weights, loaded once
    h0 = h0_ref[...].astype(jnp.float32)     # (1, H)

    def step(t, h):
        # x_ref rows already include b_ih + b_hh; only one MXU contraction per step.
        pre = x_ref[pl.ds(t, 1), :] + jnp.dot(
            h.astype(jnp.bfloat16), whh, preferred_element_type=jnp.float32)
        return jnp.tanh(pre)                 # (1, H) f32

    h_final = lax.fori_loop(0, seq_len, step, h0)

    # Classification head only once, on the final hidden state.
    logits = (jnp.dot(h_final.astype(jnp.bfloat16), wlin_ref[...],
                      preferred_element_type=jnp.float32)
              + blin_ref[...])               # (1, OP); padded lanes ~= -1e30
    m = jnp.max(logits, axis=-1, keepdims=True)
    z = logits - m
    lse = jnp.log(jnp.sum(jnp.exp(z), axis=-1, keepdims=True))
    logp_ref[...] = (z - lse).astype(logp_ref.dtype)
    hn_ref[...] = h_final.astype(hn_ref.dtype)


def prepare_params(params):
    """One-time conversion from PyTorch layouts to the kernel layout."""
    hidden_size = params["w_hh"].shape[0]
    input_size = params["w_ih"].shape[1]
    output_size = params["w_lin"].shape[0]
    out_pad = max(LANE, ((output_size + LANE - 1) // LANE) * LANE)

    wlin_t = jnp.zeros((hidden_size, out_pad), jnp.float32)
    wlin_t = wlin_t.at[:, :output_size].set(params["w_lin"].T.astype(jnp.float32))
    blin_p = jnp.full((1, out_pad), NEG_INF, jnp.float32)
    blin_p = blin_p.at[0, :output_size].set(params["b_lin"].astype(jnp.float32))

    return {
        "wih_t": params["w_ih"].T.astype(jnp.float32),                  # (I, H) f32
        "b_h": (params["b_ih"] + params["b_hh"])[None, :].astype(jnp.float32),
        "whh_t": params["w_hh"].T.astype(jnp.bfloat16),                 # (H, H) bf16
        "wlin_t": wlin_t.astype(jnp.bfloat16),                          # (H, OP) bf16
        "blin_p": blin_p,                                               # (1, OP) f32
        "input_size": input_size,
        "hidden_size": hidden_size,
        "output_size": output_size,
    }


def _bucket_len(t):
    for b in SEQ_BUCKETS:
        if t <= b:
            return b
    top = SEQ_BUCKETS[-1]
    return ((t + top - 1) // top) * top


def rnn_forward_sequence(kp, letter_idx, hidden):
    """Run the tanh-RNN over a whole sequence of letter indices in ONE kernel.

    letter_idx: int32 (T,);  hidden: (num_layers=1, 1, H).
    Returns (log_probs (1, 1, O) for the LAST step, hn (1, 1, H)) — identical to
    calling the PyTorch RNN.forward once per character and feeding hn back in.
    """
    hidden_size = kp["hidden_size"]
    output_size = kp["output_size"]
    out_pad = kp["wlin_t"].shape[1]

    letter_idx = jnp.asarray(letter_idx, jnp.int32)
    seq_len = int(letter_idx.shape[0])
    t_pad = _bucket_len(max(seq_len, 1))

    # Clamp (str.find can return -1) and pad to the bucket length; padded rows are
    # never visited because the fori_loop bound is the true length.
    idx = jnp.clip(letter_idx, 0, kp["input_size"] - 1)
    idx = jnp.pad(idx, (0, t_pad - seq_len))

    # Pre-gather the one-hot matmul and fuse the RNN biases outside the kernel.
    x_seq = jnp.take(kp["wih_t"], idx, axis=0) + kp["b_h"]             # (T_pad, H) f32

    grid_spec = pltpu.PrefetchScalarGridSpec(
        num_scalar_prefetch=1,
        grid=(1,),
        in_specs=[
            pl.BlockSpec((1, hidden_size), lambda i, l: (0, 0)),            # h0
            pl.BlockSpec((t_pad, hidden_size), lambda i, l: (0, 0)),        # x_seq
            pl.BlockSpec((hidden_size, hidden_size), lambda i, l: (0, 0)),  # W_hh^T
            pl.BlockSpec((hidden_size, out_pad), lambda i, l: (0, 0)),      # W_lin^T
            pl.BlockSpec((1, out_pad), lambda i, l: (0, 0)),                # b_lin
        ],
        out_specs=(
            pl.BlockSpec((1, out_pad), lambda i, l: (0, 0)),
            pl.BlockSpec((1, hidden_size), lambda i, l: (0, 0)),
        ),
    )

    logp_pad, hn = pl.pallas_call(
        rnn_seq_kernel,
        grid_spec=grid_spec,
        out_shape=(
            jax.ShapeDtypeStruct((1, out_pad), jnp.float32),
            jax.ShapeDtypeStruct((1, hidden_size), jnp.float32),
        ),
        compiler_params=pltpu.CompilerParams(
            dimension_semantics=("arbitrary",)),   # single sequential step
    )(
        jnp.asarray([seq_len], jnp.int32),          # scalar-prefetched loop bound
        hidden[0].astype(jnp.float32),
        x_seq,
        kp["whh_t"], kp["wlin_t"], kp["blin_p"],
    )

    log_probs = logp_pad[:, :output_size]           # drop padded lanes
    return log_probs[None, ...], hn[None, ...]


def rnn_forward(kp, inp, hidden):
    """Mirrors RNN.forward(input, hidden) for a single one-hot step (1, I)."""
    idx = jnp.argmax(inp, axis=-1).astype(jnp.int32)    # (1,)
    return rnn_forward_sequence(kp, idx, hidden)


def line_to_indices(line, all_letters):
    """Letter indices for a name (replaces the one-hot lineToTensor host loop)."""
    idx = np.array([all_letters.find(c) for c in line], dtype=np.int32)
    return jnp.asarray(np.clip(idx, 0, len(all_letters) - 1))


def init_params(key, input_size, hidden_size, output_size):
    """Deterministic init, PyTorch-style U(-1/sqrt(H), 1/sqrt(H))."""
    ks = jax.random.split(key, 6)
    bound = 1.0 / jnp.sqrt(jnp.float32(hidden_size))

    def u(k, shape):
        return jax.random.uniform(k, shape, jnp.float32, -bound, bound)

    return {
        "w_ih": u(ks[0], (hidden_size, input_size)),
        "w_hh": u(ks[1], (hidden_size, hidden_size)),
        "b_ih": u(ks[2], (hidden_size,)),
        "b_hh": u(ks[3], (hidden_size,)),
        "w_lin": u(ks[4], (output_size, hidden_size)),
        "b_lin": u(ks[5], (output_size,)),
    }


if __name__ == "__main__":
    all_letters = string.ascii_letters + " .,;'"
    n_letters = len(all_letters)          # 57
    n_hidden = 128
    n_categories = 18                     # synthetic output_size (>0)

    key = jax.random.PRNGKey(0)
    params = init_params(key, n_letters, n_hidden, n_categories)
    kp = prepare_params(params)           # transposes / bias fusion / padding / bf16 once

    line = "Bai"
    idx = line_to_indices(line, all_letters)                 # (3,)
    hidden0 = jnp.zeros((1, 1, n_hidden), jnp.float32)       # initHidden()

    # Whole name in one fused kernel call.
    log_probs, hn = rnn_forward_sequence(kp, idx, hidden0)
    # Single-step call, like RNN.forward(lineToTensor('B').squeeze(0), hidden).
    inp_B = jax.nn.one_hot(jnp.array([all_letters.find("B")]), n_letters,
                           dtype=jnp.float32)                # (1, 57)
    log_probs_1, hn_1 = rnn_forward(kp, inp_B, hidden0)
    jax.block_until_ready((log_probs, hn, log_probs_1, hn_1))

    # Pure-JAX reference reproducing the kernel numerics (same bf16-rounded weights).
    wih_t = kp["wih_t"]
    b_h = kp["b_h"]
    whh_f32 = kp["whh_t"].astype(jnp.float32)
    wlin_f32 = kp["wlin_t"].astype(jnp.float32)[:, :n_categories]
    b_lin = params["b_lin"][None, :].astype(jnp.float32)

    def ref_step(h, i):
        x = wih_t[i][None, :] + b_h
        h_bf = h.astype(jnp.bfloat16).astype(jnp.float32)
        return jnp.tanh(x + jnp.dot(h_bf, whh_f32, precision=lax.Precision.HIGHEST))

    def ref_head(h):
        h_bf = h.astype(jnp.bfloat16).astype(jnp.float32)
        logits = jnp.dot(h_bf, wlin_f32, precision=lax.Precision.HIGHEST) + b_lin
        return jax.nn.log_softmax(logits, axis=-1)

    h_ref = hidden0[0]
    for i in np.array(idx):
        h_ref = ref_step(h_ref, int(i))
    logp_ref = ref_head(h_ref)

    assert log_probs.shape == (1, 1, n_categories)
    assert hn.shape == (1, 1, n_hidden)
    assert jnp.allclose(log_probs[0], logp_ref, atol=1e-4)
    assert jnp.allclose(hn[0], h_ref, atol=1e-4)

    # Single-step (seq_len=1) check against the same math.
    h1_ref = ref_step(hidden0[0], all_letters.find("B"))
    logp1_ref = ref_head(h1_ref)
    assert jnp.allclose(log_probs_1[0], logp1_ref, atol=1e-4)
    assert jnp.allclose(hn_1[0], h1_ref, atol=1e-4)

    print("KERNEL_OK")
</pallas_src>

<mosaic_0001>
module attributes {stable_mosaic.version = 11 : i64} {
  func.func @rnn_seq_kernel(%arg0: i32, %arg1: memref<1xi32, #tpu.memory_space<smem>>, %arg2: memref<1x128xf32, #tpu.memory_space<vmem>>, %arg3: memref<8x128xf32, #tpu.memory_space<vmem>>, %arg4: memref<128x128xbf16, #tpu.memory_space<vmem>>, %arg5: memref<128x128xbf16, #tpu.memory_space<vmem>>, %arg6: memref<1x128xf32, #tpu.memory_space<vmem>>, %arg7: memref<1x128xf32, #tpu.memory_space<vmem>>, %arg8: memref<1x128xf32, #tpu.memory_space<vmem>>) attributes {dimension_semantics = [#tpu.dimension_semantics<arbitrary>], iteration_bounds = array<i64: 1>, scalar_prefetch = 1 : i64, scratch_operands = 0 : i64, tpu.core_type = #tpu.core_type<tc>, window_params = [{pipeline_mode = #tpu.pipeline_mode<synchronous>, transform_indices = @transform_0, window_bounds = array<i64: 1, 128>}, {pipeline_mode = #tpu.pipeline_mode<synchronous>, transform_indices = @transform_1, window_bounds = array<i64: 8, 128>}, {pipeline_mode = #tpu.pipeline_mode<synchronous>, transform_indices = @transform_2, window_bounds = array<i64: 128, 128>}, {pipeline_mode = #tpu.pipeline_mode<synchronous>, transform_indices = @transform_3, window_bounds = array<i64: 128, 128>}, {pipeline_mode = #tpu.pipeline_mode<synchronous>, transform_indices = @transform_4, window_bounds = array<i64: 1, 128>}, {pipeline_mode = #tpu.pipeline_mode<synchronous>, transform_indices = @transform_5, window_bounds = array<i64: 1, 128>}, {pipeline_mode = #tpu.pipeline_mode<synchronous>, transform_indices = @transform_6, window_bounds = array<i64: 1, 128>}]} {
    %c0 = arith.constant 0 : index
    %0 = memref.load %arg1[%c0] : memref<1xi32, #tpu.memory_space<smem>>
    %c0_0 = arith.constant 0 : index
    %c0_1 = arith.constant 0 : index
    %1 = vector.load %arg4[%c0_0, %c0_1] : memref<128x128xbf16, #tpu.memory_space<vmem>>, vector<128x128xbf16>
    %c0_2 = arith.constant 0 : index
    %c0_3 = arith.constant 0 : index
    %2 = vector.load %arg2[%c0_2, %c0_3] : memref<1x128xf32, #tpu.memory_space<vmem>>, vector<1x128xf32>
    %c0_i32 = arith.constant 0 : i32
    %3 = arith.subi %0, %c0_i32 : i32
    %4 = arith.addi %c0_i32, %3 : i32
    %c1_i32 = arith.constant 1 : i32
    %5 = scf.for %arg9 = %c0_i32 to %4 step %c1_i32 iter_args(%arg10 = %2) -> (vector<1x128xf32>)  : i32 {
      %23 = arith.index_cast %arg9 : i32 to index
      %c0_14 = arith.constant 0 : index
      %24 = vector.load %arg3[%23, %c0_14] : memref<8x128xf32, #tpu.memory_space<vmem>>, vector<1x128xf32>
      %25 = arith.truncf %arg10 : vector<1x128xf32> to vector<1x128xbf16>
      %cst_15 = arith.constant dense<0.000000e+00> : vector<1x128xf32>
      %26 = tpu.matmul %25, %1, %cst_15 {dimension_numbers = #tpu.dot_dimension_numbers<[1], [0], [0], [1], [0, 0, 1, 1], [], []>} : vector<1x128xbf16>, vector<128x128xbf16>, vector<1x128xf32> -> vector<1x128xf32>
      %27 = arith.addf %24, %26 : vector<1x128xf32>
      %28 = math.tanh %27 : vector<1x128xf32>
      scf.yield %28 : vector<1x128xf32>
    }
    %6 = arith.truncf %5 : vector<1x128xf32> to vector<1x128xbf16>
    %c0_4 = arith.constant 0 : index
    %c0_5 = arith.constant 0 : index
    %7 = vector.load %arg5[%c0_4, %c0_5] : memref<128x128xbf16, #tpu.memory_space<vmem>>, vector<128x128xbf16>
    %cst = arith.constant dense<0.000000e+00> : vector<1x128xf32>
    %8 = tpu.matmul %6, %7, %cst {dimension_numbers = #tpu.dot_dimension_numbers<[1], [0], [0], [1], [0, 0, 1, 1], [], []>} : vector<1x128xbf16>, vector<128x128xbf16>, vector<1x128xf32> -> vector<1x128xf32>
    %c0_6 = arith.constant 0 : index
    %c0_7 = arith.constant 0 : index
    %9 = vector.load %arg6[%c0_6, %c0_7] : memref<1x128xf32, #tpu.memory_space<vmem>>, vector<1x128xf32>
    %10 = arith.addf %8, %9 : vector<1x128xf32>
    %cst_8 = arith.constant dense<0xFF800000> : vector<1xf32>
    %11 = vector.multi_reduction <maximumf>, %10, %cst_8 [1] : vector<1x128xf32> to vector<1xf32>
    %12 = vector.shape_cast %11 : vector<1xf32> to vector<1x1xf32>
    %13 = vector.broadcast %12 : vector<1x1xf32> to vector<1x128xf32>
    %14 = arith.subf %10, %13 : vector<1x128xf32>
    %15 = math.exp %14 : vector<1x128xf32>
    %cst_9 = arith.constant dense<0.000000e+00> : vector<1xf32>
    %16 = vector.multi_reduction <add>, %15, %cst_9 [1] : vector<1x128xf32> to vector<1xf32>
    %17 = vector.shape_cast %16 : vector<1xf32> to vector<1x1xf32>
    %18 = math.log %17 : vector<1x1xf32>
    %19 = vector.broadcast %18 : vector<1x1xf32> to vector<1x128xf32>
    %20 = arith.subf %14, %19 : vector<1x128xf32>
    %c0_10 = arith.constant 0 : index
    %c0_11 = arith.constant 0 : index
    %21 = vector.load %arg7[%c0_10, %c0_11] : memref<1x128xf32, #tpu.memory_space<vmem>>, vector<1x128xf32>
    tpu.vector_store %arg7[%c0_10, %c0_11], %20 {strides = array<i32>} : memref<1x128xf32, #tpu.memory_space<vmem>>, vector<1x128xf32>,
    %c0_12 = arith.constant 0 : index
    %c0_13 = arith.constant 0 : index
    %22 = vector.load %arg8[%c0_12, %c0_13] : memref<1x128xf32, #tpu.memory_space<vmem>>, vector<1x128xf32>
    tpu.vector_store %arg8[%c0_12, %c0_13], %5 {strides = array<i32>} : memref<1x128xf32, #tpu.memory_space<vmem>>, vector<1x128xf32>,
    return
  }
  func.func @transform_0(%arg0: i32, %arg1: memref<1xi32, #tpu.memory_space<smem>>) -> (i32, i32) {
    %c0_i32 = arith.constant 0 : i32
    %c0_i32_0 = arith.constant 0 : i32
    %c0_i32_1 = arith.constant 0 : i32
    return %c0_i32, %c0_i32_0 : i32, i32
  }
  func.func @transform_1(%arg0: i32, %arg1: memref<1xi32, #tpu.memory_space<smem>>) -> (i32, i32) {
    %c0_i32 = arith.constant 0 : i32
    %c0_i32_0 = arith.constant 0 : i32
    %c0_i32_1 = arith.constant 0 : i32
    return %c0_i32, %c0_i32_0 : i32, i32
  }
  func.func @transform_2(%arg0: i32, %arg1: memref<1xi32, #tpu.memory_space<smem>>) -> (i32, i32) {
    %c0_i32 = arith.constant 0 : i32
    %c0_i32_0 = arith.constant 0 : i32
    %c0_i32_1 = arith.constant 0 : i32
    return %c0_i32, %c0_i32_0 : i32, i32
  }
  func.func @transform_3(%arg0: i32, %arg1: memref<1xi32, #tpu.memory_space<smem>>) -> (i32, i32) {
    %c0_i32 = arith.constant 0 : i32
    %c0_i32_0 = arith.constant 0 : i32
    %c0_i32_1 = arith.constant 0 : i32
    return %c0_i32, %c0_i32_0 : i32, i32
  }
  func.func @transform_4(%arg0: i32, %arg1: memref<1xi32, #tpu.memory_space<smem>>) -> (i32, i32) {
    %c0_i32 = arith.constant 0 : i32
    %c0_i32_0 = arith.constant 0 : i32
    %c0_i32_1 = arith.constant 0 : i32
    return %c0_i32, %c0_i32_0 : i32, i32
  }
  func.func @transform_5(%arg0: i32, %arg1: memref<1xi32, #tpu.memory_space<smem>>) -> (i32, i32) {
    %c0_i32 = arith.constant 0 : i32
    %c0_i32_0 = arith.constant 0 : i32
    %c0_i32_1 = arith.constant 0 : i32
    return %c0_i32, %c0_i32_0 : i32, i32
  }
  func.func @transform_6(%arg0: i32, %arg1: memref<1xi32, #tpu.memory_space<smem>>) -> (i32, i32) {
    %c0_i32 = arith.constant 0 : i32
    %c0_i32_0 = arith.constant 0 : i32
    %c0_i32_1 = arith.constant 0 : i32
    return %c0_i32, %c0_i32_0 : i32, i32
  }
}

</mosaic_0001>

<bundles_post_ra>
// kernel: tpu_custom_call.1
= control target key start
LH: loop header
LB: loop body
LE: loop exit
PB: predicated region body
PF: predicated region fallthrough
CT: control target
= control target key end

     0   :  { %14 = vsyncpa [#allocation5], 0  ;;  %s708_s0 = inlined_call_operand.<no memory space> [shape: s32[1], index: 0, kind: input, shape index: {}]   ;;  %s709_s1 = inlined_call_operand.vmem [shape: f32[1,128], index: 1, kind: input, shape index: {}]   ;;  %s710_s2 = inlined_call_operand.hbm [shape: f32[8,128], index: 2, kind: input, shape index: {}]   ;;  %s711_s3 = inlined_call_operand.hbm [shape: bf16[128,128], index: 3, kind: input, shape index: {}]   ;;  %s712_s4 = inlined_call_operand.hbm [shape: bf16[128,128], index: 4, kind: input, shape index: {}]   ;;  %s713_s5 = inlined_call_operand.vmem [shape: f32[1,128], index: 5, kind: input, shape index: {}]   ;;  %s714_s6 = inlined_call_operand.hbm [shape: f32[1,128], index: 6, kind: output, shape index: {0}]   ;;  %s715_s7 = inlined_call_operand.hbm [shape: f32[1,128], index: 7, kind: output, shape index: {1}]  }
   0x1   :  { %15 = vsyncpa [#allocation8], 0 }
   0x2   :  { %16 = vsyncpa [#allocation6], 0 }
   0x3   :  { %17 = vsyncpa [#allocation12], 0  ;;  %s600_s24 = smov [#allocation7]  }
   0x4   :  { %s35_s25 = sshll.u32 %s600_s24, 4  ;;  %s36_s25 = int_to_ptr.vmem [resolvable:$true] %s35_s25 }
   0x5   :  { %s476_s26 = scalar_lea.vmem %s36_s25, 1024  ;;  %p481_p1 = scmp.lt.s32.totalorder %s36_s25, %s36_s25 }
   0x6   :  { %p477_p0 = scmp.ne.s32.totalorder %s36_s25, %s476_s26  ;;  %p482_p2 = scmp.lt.s32.totalorder %s476_s26, %s476_s26 }
   0x8   :  { %p483_p3 = por %p482_p2, %p481_p1 }
   0xa   :  { %p484_p4 = pnand %p483_p3, %p477_p0 }
   0xc   :  { %487 = shalt.err (!%p484_p4)
}
   0xd   :  { %s601_s27 = smov 64   ;;  %s602_s28 = smov 4  }
   0xe   :  { %41 = dma.hbm_to_vmem [thread:$0]  %s711_s3, 1024, %s36_s25, [#allocation8], %s601_s27, %s601_s27, %s602_s28  }
   0xf   :  { %s603_s8 = smov [#allocation4]   ;;  %s604_s10 = smov [#allocation9]  }
  0x10   :  { %s26_s9 = sshll.u32 %s603_s8, 4  ;;  %s47_s11 = sshll.u32 %s604_s10, 4  ;;  %s27_s9 = int_to_ptr.vmem [resolvable:$true] %s26_s9  ;;  %s48_s11 = int_to_ptr.vmem [resolvable:$true] %s47_s11 }
  0x11   :  { %s496_s12 = scalar_lea.vmem %s27_s9, 128  ;;  %p501_p6 = scmp.lt.s32.totalorder %s27_s9, %s27_s9 }
  0x12   :  { %p497_p5 = scmp.ne.s32.totalorder %s27_s9, %s496_s12  ;;  %p502_p7 = scmp.lt.s32.totalorder %s496_s12, %s496_s12 }
  0x14   :  { %p503_p8 = por %p502_p7, %p501_p6 }
  0x16   :  { %p504_p9 = pnand %p503_p8, %p497_p5 }
  0x18   :  { %507 = shalt.err (!%p504_p9)
}
  0x19   :  { %29 = dma.hbm_to_vmem [thread:$0]  %s710_s2, 128, %s27_s9, [#allocation5]  }
  0x1a   :  { %s516_s15 = scalar_lea.vmem %s48_s11, 1024  ;;  %p521_p11 = scmp.lt.s32.totalorder %s48_s11, %s48_s11 }
  0x1b   :  { %p517_p10 = scmp.ne.s32.totalorder %s48_s11, %s516_s15  ;;  %p522_p12 = scmp.lt.s32.totalorder %s516_s15, %s516_s15 }
  0x1d   :  { %p523_p13 = por %p522_p12, %p521_p11 }
  0x1f   :  { %p524_p0 = pnand %p523_p13, %p517_p10 }
  0x21   :  { %527 = shalt.err (!%p524_p0)
}
  0x22   :  { %53 = dma.hbm_to_vmem [thread:$0]  %s712_s4, 1024, %s48_s11, [#allocation8], %s601_s27, %s601_s27, %s602_s28  }
  0x23   :  { %580 = dma.done.wait [#allocation5], 128  }
  0x24   :  { %581 = vsyncadd [#allocation5], 4294967168 }
  0x25   :  { %582 = dma.done.wait [#allocation8], 2048  }
  0x26   :  { %583 = vsyncadd [#allocation8], 4294965248  ;;  %v660_v0 = vld [vmem:[#allocation7] sm:$0xf]  ;;  %v662_v1 = vld [vmem:[#allocation7 + $0x4] sm:$0xf] }
  0x27   :  { %v664_v2 = vld [vmem:[#allocation7 + $0x8] sm:$0xf]  ;;  %v666_v3 = vld [vmem:[#allocation7 + $0xc] sm:$0xf]  ;;  %v668_v4 = vld [vmem:[#allocation7 + $0x10] sm:$0xf] }
  0x28   :  { %v670_v5 = vld [vmem:[#allocation7 + $0x14] sm:$0xf]  ;;  %v672_v6 = vld [vmem:[#allocation7 + $0x18] sm:$0xf]  ;;  %v74_v7 = vld [vmem:[#allocation7 + $0x1c] sm:$0xf] }
  0x29   :  { %v75_v8 = vld [vmem:[#allocation7 + $0x20] sm:$0xf]  ;;  %v76_v9 = vld [vmem:[#allocation7 + $0x24] sm:$0xf]  ;;  %v77_v10 = vld [vmem:[#allocation7 + $0x28] sm:$0xf] }
  0x2a   :  { %v78_v11 = vld [vmem:[#allocation7 + $0x2c] sm:$0xf]  ;;  %v79_v12 = vld [vmem:[#allocation7 + $0x30] sm:$0xf]  ;;  %v80_v13 = vld [vmem:[#allocation7 + $0x34] sm:$0xf] }
  0x2b   :  { %v81_v14 = vld [vmem:[#allocation7 + $0x38] sm:$0xf]  ;;  %v82_v15 = vld [vmem:[#allocation7 + $0x3c] sm:$0xf]  ;;  %p344_p1 = scmp.le.s32.totalorder %s708_s0, 0 }
  0x2c   :  { %v83_v16 = vld [vmem:[%s709_s1] sm:$0x1]   ;;  %s680_s19 = smov (!%p344_p1), 0  }
  0x2d   :  { %v596_v17 = vmov %v83_v16   ;;  %339 = sbr.rel (%p344_p1) target bundleno = 294 (0x126), region = 62 }
  0x32   :  { %v588_v18 = vmov %v83_v16  }
  0x33 LB: > { %v352_v19 = vcombine.low %v81_v14, %v82_v15  ;;  %v605_v20 = vmov 0.0   ;;  %v351_v21 = vcombine.low %v79_v12, %v80_v13  ;;  %vm606_vm0 = vmmov 0   ;;  %s91_s1 = scalar_lea.vmem [#allocation4], %s594_s19  ;;  %s87_s19 = sadd.s32 1, %s594_s19   ;;  %s594_s19 = sphi %s680_s19, %s87_s19   ;;  %v590_v18 = vphi %v588_v18, %v589_v18  }
  0x34   : > { %379 = vmatprep.subr.bf16.mxu0 %v605_v20  ;;  %395 = vmatprep.mubr.msk.bf16.mxu0 %vm606_vm0, %v605_v20  ;;  %v350_v22 = vcombine.low %v77_v10, %v78_v11  ;;  %v349_v23 = vcombine.low %v75_v8, %v76_v9  ;;  %v348_v24 = vcombine.low %v672_v6, %v74_v7  ;;  %v92_v29 = vld [vmem:[%s91_s1] sm:$0x1]  ;;  %p86_p2 = scmp.ge.s32.totalorder %s87_s19, %s708_s0 }
  0x35   : > { %380 = vmatpush3.bf16.msra.mxu0 %v352_v19  ;;  %v347_v25 = vcombine.low %v668_v4, %v670_v5  ;;  %v346_v26 = vcombine.low %v664_v2, %v666_v3  ;;  %v345_v27 = vcombine.low %v660_v0, %v662_v1  ;;  %v93_v28 = vpack.c.bf16 %v590_v18, %v590_v18 }
  0x36   : > { %381 = vmatprep.subr.bf16.mxu0 %v605_v20 }
  0x39   : > { %382 = vmatpush3.bf16.msra.mxu0 %v351_v21 }
  0x3a   : > { %383 = vmatprep.subr.bf16.mxu0 %v605_v20 }
  0x3d   : > { %384 = vmatpush3.bf16.msra.mxu0 %v350_v22 }
  0x3e   : > { %385 = vmatprep.subr.bf16.mxu0 %v605_v20 }
  0x41   : > { %386 = vmatpush3.bf16.msra.mxu0 %v349_v23 }
  0x42   : > { %387 = vmatprep.subr.bf16.mxu0 %v605_v20 }
  0x45   : > { %388 = vmatpush3.bf16.msra.mxu0 %v348_v24 }
  0x46   : > { %389 = vmatprep.subr.bf16.mxu0 %v605_v20 }
  0x49   : > { %390 = vmatpush3.bf16.msra.mxu0 %v347_v25 }
  0x4a   : > { %391 = vmatprep.subr.bf16.mxu0 %v605_v20 }
  0x4d   : > { %392 = vmatpush3.bf16.msra.mxu0 %v346_v26 }
  0x4e   : > { %393 = vmatprep.subr.bf16.mxu0 %v605_v20 }
  0x51   : > { %394 = vmatpush3.bf16.msra.mxu0 %v345_v27 }
  0x54   : > { %396 = vmatmul.mubr.bf16.vlgmr.msra.gmra.mxu0 %v93_v28 }
 0x114   : > { %v176_v30 = vpop.f32.mrf.mxu0 }
 0x115   : > { %v182_v31 = vadd.f32 %v176_v30, %v92_v29 }
 0x116   : > { %v397_v32 = vpop.f32.mrf.mxu0 }
 0x117   : > { %454 = vtanh.f32 %v182_v31 }
 0x118   : > { %v179_v33 = vpop.f32.mrf.mxu0 }
 0x11a   : > { %v398_v34 = vpop.f32.mrf.mxu0 }
 0x121   :  { %89 = sbr.rel (!%p86_p2) target bundleno = 51 (0x33), region = 68 }
 0x124   : > { %v455_v35 = vpop.eup %454  }
 0x125   : > { %v589_v18 = vmov %v455_v35   ;;  %v597_v17 = vmov (%p86_p2), %v455_v35  }
 0x126 PF:  { %v456_v36 = vld [vmem:[#allocation9 + $0x38] sm:$0xff]   ;;  %304 = vst [vmem:[#allocation11] sm:$0x1] %v598_v17  ;;  %v607_v37 = vmov 0.0   ;;  %v457_v38 = vld [vmem:[#allocation9 + $0x30] sm:$0xff]   ;;  %vm608_vm1 = vmmov 0   ;;  %v184_v45 = vpack.c.bf16 %v598_v17, %v598_v17  ;;  %v598_v17 = vphi %v596_v17, %v597_v17  }
 0x127   :  { %399 = vmatprep.subr.bf16.mxu0 %v607_v37  ;;  %415 = vmatprep.mubr.msk.bf16.mxu0 %vm608_vm1, %v607_v37  ;;  %v458_v39 = vld [vmem:[#allocation9 + $0x28] sm:$0xff]   ;;  %v459_v40 = vld [vmem:[#allocation9 + $0x20] sm:$0xff]   ;;  %v460_v41 = vld [vmem:[#allocation9 + $0x18] sm:$0xff]   ;;  %vm290_vm2 = vcmask 1040384   ;;  %s609_s23 = smov [#allocation11]  }
 0x128   :  { %400 = vmatpush3.bf16.msra.mxu0 %v456_v36  ;;  %v461_v42 = vld [vmem:[#allocation9 + $0x10] sm:$0xff]   ;;  %v462_v43 = vld [vmem:[#allocation9 + $0x8] sm:$0xff]   ;;  %v463_v44 = vld [vmem:[#allocation9] sm:$0xff]   ;;  %s321_s24 = sshll.u32 %s609_s23, 4  ;;  %s322_s24 = int_to_ptr.vmem [resolvable:$true] %s321_s24 }
 0x129   :  { %401 = vmatprep.subr.bf16.mxu0 %v607_v37  ;;  %v201_v46 = vld [vmem:[%s713_s5] sm:$0x1]  ;;  %s528_s25 = scalar_lea.vmem %s322_s24, 16  ;;  %s532_s5 = scalar_lea.vmem %s322_s24, 32 }
 0x12a   :  { %p529_p3 = scmp.ne.s32.totalorder %s322_s24, %s528_s25  ;;  %p533_p4 = scmp.lt.s32.totalorder %s322_s24, %s322_s24 }
 0x12b   :  { %p534_p5 = scmp.lt.s32.totalorder %s532_s5, %s528_s25 }
 0x12c   :  { %402 = vmatpush3.bf16.msra.mxu0 %v457_v38 }
 0x12d   :  { %403 = vmatprep.subr.bf16.mxu0 %v607_v37  ;;  %p535_p6 = por %p534_p5, %p533_p4 }
 0x12f   :  { %p536_p7 = pnand %p535_p6, %p529_p3 }
 0x130   :  { %404 = vmatpush3.bf16.msra.mxu0 %v458_v39 }
 0x131   :  { %405 = vmatprep.subr.bf16.mxu0 %v607_v37 }
 0x134   :  { %406 = vmatpush3.bf16.msra.mxu0 %v459_v40 }
 0x135   :  { %407 = vmatprep.subr.bf16.mxu0 %v607_v37 }
 0x138   :  { %408 = vmatpush3.bf16.msra.mxu0 %v460_v41 }
 0x139   :  { %409 = vmatprep.subr.bf16.mxu0 %v607_v37 }
 0x13c   :  { %410 = vmatpush3.bf16.msra.mxu0 %v461_v42 }
 0x13d   :  { %411 = vmatprep.subr.bf16.mxu0 %v607_v37 }
 0x140   :  { %412 = vmatpush3.bf16.msra.mxu0 %v462_v43 }
 0x141   :  { %413 = vmatprep.subr.bf16.mxu0 %v607_v37 }
 0x144   :  { %414 = vmatpush3.bf16.msra.mxu0 %v463_v44 }
 0x147   :  { %416 = vmatmul.mubr.bf16.vlgmr.msra.gmra.mxu0 %v184_v45 }
 0x207   :  { %v284_v47 = vpop.f32.mrf.mxu0 }
 0x208   :  { %v285_v48 = vadd.f32 %v284_v47, %v201_v46 }
 0x209   :  { %v417_v49 = vpop.f32.mrf.mxu0 }
 0x20a   :  { %v291_v50 = vsel %vm290_vm2, %v285_v48, -inf }
 0x20b   :  { %292 = vmax.xlane.f32.xlu0 %v291_v50  ;;  %v287_v51 = vpop.f32.mrf.mxu0 }
 0x20d   :  { %v418_v52 = vpop.f32.mrf.mxu0 }
 0x294   :  { %v293_v53 = vpop.xlane.xlu0 %292 }
 0x295   :  { %v294_v54 = vsub.f32 %v285_v48, %v293_v53 }
 0x297   :  { %v295_v55 = vmul.f32 1.442695, %v294_v54 }
 0x299   :  { %464 = vpow2.f32 %v295_v55 }
 0x2a6   :  { %v465_v56 = vpop.eup %464 }
 0x2a7   :  { %v297_v57 = vsel %vm290_vm2, %v465_v56, 0.0 }
 0x2a8   :  { %298 = vadd.xlane.f32.xlu0 %v297_v57 }
 0x2a9   :  { %539 = shalt.err (!%p536_p7)
}
 0x2aa   :  { %324 = dma.vmem_to_hbm [thread:$0]  %s322_s24, 16, %s715_s7, [#allocation12]  }
 0x2ab   :  { %s610_s28 = smov [#allocation10]  }
 0x2ac   :  { %s311_s29 = sshll.u32 %s610_s28, 4  ;;  %s312_s29 = int_to_ptr.vmem [resolvable:$true] %s311_s29 }
 0x2ad   :  { %s548_s30 = scalar_lea.vmem %s312_s29, 16  ;;  %s552_s8 = scalar_lea.vmem %s312_s29, 32 }
 0x2ae   :  { %p549_p8 = scmp.ne.s32.totalorder %s312_s29, %s548_s30  ;;  %p553_p9 = scmp.lt.s32.totalorder %s312_s29, %s312_s29 }
 0x2af   :  { %p554_p10 = scmp.lt.s32.totalorder %s552_s8, %s548_s30 }
 0x2b1   :  { %p555_p11 = por %p554_p10, %p553_p9 }
 0x2b3   :  { %p556_p12 = pnand %p555_p11, %p549_p8 }
 0x331   :  { %v299_v58 = vpop.xlane.xlu0 %298 }
 0x332   :  { %466 = vlog2.f32 %v299_v58 }
 0x33f   :  { %v467_v59 = vpop.eup %466 }
 0x340   :  { %v301_v60 = vmul.f32 0.6931472, %v467_v59 }
 0x342   :  { %v302_v61 = vsub.f32 %v294_v54, %v301_v60 }
 0x344   :  { %303 = vst [vmem:[#allocation10] sm:$0x1] %v302_v61 }
 0x345   :  { %559 = shalt.err (!%p556_p12)
}
 0x346   :  { %314 = dma.vmem_to_hbm [thread:$0]  %s312_s29, 16, %s714_s6, [#allocation6]  }
 0x347   :  { %584 = dma.done.wait [#allocation6], 16  }
 0x348   :  { %585 = vsyncadd [#allocation6], 4294967280 }
 0x349   :  { %586 = dma.done.wait [#allocation12], 16  }
 0x34a   :  { %587 = vsyncadd [#allocation12], 4294967280 }
 0x34b   :  { %331 = vsyncpa [#allocation5], 1 }
 0x34c   :  { %332 = vsyncpa [#allocation8], 1 }
 0x34d   :  { %333 = vsyncpa [#allocation6], 1 }
 0x34e   :  { %334 = vsyncpa [#allocation12], 1 }

</bundles_post_ra>
